<compile_context>
chip_gen: v6e
topology: v6e:2x2x1
jax: 0.10.0
libtpu: 0.0.40
codegen_flags: <defaults>
</compile_context>

<pallas_src>
import functools

import numpy as np
import jax
import jax.numpy as jnp
from jax.experimental import pallas as pl
from jax.experimental.pallas import tpu as pltpu

_SUBLANE = 8


def _round_up(x, m):
    return ((x + m - 1) // m) * m


def _mlp_layer_kernel(x_ref, w_ref, b_ref, o_ref):
    # x_ref: (tm, K)  w_ref: (K, N)  b_ref: (1, N)  o_ref: (tm, N)
    acc = jnp.dot(x_ref[...], w_ref[...], preferred_element_type=jnp.float32)
    acc = acc + b_ref[...]                                    # f32 bias add (VPU)
    o_ref[...] = jnp.maximum(acc, 0.0).astype(o_ref.dtype)    # ReLU


def prepare_mlp_layer_params(weight, bias):
    """One-time parameter prep (hoisted out of the per-forward path).

    weight: (dim_out, dim_in) PyTorch nn.Linear layout -> returns W^T (dim_in, dim_out)
    bias:   (dim_out,)                                  -> returns (1, dim_out)
    """
    dim_out, dim_in = weight.shape
    w_t = jnp.transpose(jnp.asarray(weight))        # (K, N), materialized once
    b2 = jnp.asarray(bias).reshape(1, dim_out)      # (1, N) for lane-dense broadcast
    return w_t, b2


@functools.partial(jax.jit, static_argnames=("tm", "compute_dtype"))
def _mlp_layer_call(x, w_t, b2, tm, compute_dtype):
    M, K = x.shape
    Kw, N = w_t.shape
    assert Kw == K
    out_dtype = x.dtype

    if compute_dtype is not None:
        x = x.astype(compute_dtype)
        w_t = w_t.astype(compute_dtype)

    Mp = _round_up(M, tm)
    if Mp != M:
        x = jnp.pad(x, ((0, Mp - M), (0, 0)))

    in_itemsize = np.dtype(x.dtype).itemsize
    out_itemsize = np.dtype(out_dtype).itemsize

    # Resident weight + bias + double-buffered x/out tiles, with 2x headroom.
    vmem_need = ((K * N) * in_itemsize + N * 4
                 + 2 * tm * (K * in_itemsize + N * out_itemsize))
    vmem_limit = int(min(64 * 1024 * 1024, max(2 * vmem_need, 16 * 1024 * 1024)))

    cost = pl.CostEstimate(
        flops=2 * Mp * N * K,
        transcendentals=0,
        bytes_accessed=int(Mp * K * in_itemsize + K * N * in_itemsize
                           + N * 4 + Mp * N * out_itemsize),
    )

    out = pl.pallas_call(
        _mlp_layer_kernel,
        out_shape=jax.ShapeDtypeStruct((Mp, N), out_dtype),
        grid_spec=pltpu.PrefetchScalarGridSpec(
            num_scalar_prefetch=0,
            grid=(Mp // tm,),                              # rows only
            in_specs=[
                pl.BlockSpec((tm, K), lambda i: (i, 0)),   # x tile, full K
                pl.BlockSpec((K, N), lambda i: (0, 0)),    # whole W^T, VMEM-resident
                pl.BlockSpec((1, N), lambda i: (0, 0)),    # whole bias, VMEM-resident
            ],
            out_specs=pl.BlockSpec((tm, N), lambda i: (i, 0)),  # lane-dense full-N slab
        ),
        compiler_params=pltpu.CompilerParams(
            dimension_semantics=("parallel",),
            vmem_limit_bytes=vmem_limit,
        ),
        cost_estimate=cost,
    )(x, w_t, b2)

    if Mp != M:
        out = out[:M]
    return out


def mlp_layer_forward(x, w_t, b2, *, tm=None, compute_dtype=None):
    """ReLU(x @ W + b) with W pre-transposed to (dim_in, dim_out).

    x: (..., dim_in) -> (..., dim_out). Arbitrary leading dims / ragged batch
    sizes are handled by flattening + row padding in this wrapper.
    Set compute_dtype=jnp.bfloat16 to halve HBM traffic (f32 accumulation kept).
    """
    orig_shape = x.shape
    K = orig_shape[-1]
    N = w_t.shape[1]
    x2 = x.reshape(-1, K)
    M = x2.shape[0]

    if tm is None:
        in_itemsize = np.dtype(
            compute_dtype if compute_dtype is not None else x.dtype).itemsize
        out_itemsize = np.dtype(x.dtype).itemsize
        # Keep resident weight + double-buffered x/out tiles under ~32 MiB
        # (safe even with v7x's 64 MiB VMEM per TensorCore).
        budget = 32 * 1024 * 1024 - (K * N * in_itemsize + N * 4)
        per_row = 2 * (K * in_itemsize + N * out_itemsize)
        tm_cap = max(_SUBLANE, budget // per_row)
        tm = min(_round_up(M, _SUBLANE), 512, int(tm_cap))
        tm = max(_SUBLANE, (tm // _SUBLANE) * _SUBLANE)

    out = _mlp_layer_call(x2, w_t, b2, int(tm), compute_dtype)
    return out.reshape(orig_shape[:-1] + (N,))


def init_mlp_layer_params(key, dim_in, dim_out):
    """Deterministic init matching nn.Linear defaults: U(-1/sqrt(dim_in), +1/sqrt(dim_in))."""
    kw, kb = jax.random.split(key)
    bound = 1.0 / jnp.sqrt(jnp.float32(dim_in))
    weight = jax.random.uniform(kw, (dim_out, dim_in), jnp.float32, -bound, bound)
    bias = jax.random.uniform(kb, (dim_out,), jnp.float32, -bound, bound)
    return weight, bias


if __name__ == "__main__":
    key = jax.random.PRNGKey(0)
    kx, kp = jax.random.split(key)

    # Small shapes consistent with the module: a flat batch of 256 coordinate
    # feature vectors, dim_in=64 -> dim_out=128.
    M, dim_in, dim_out = 256, 64, 128
    x = jax.random.normal(kx, (M, dim_in), jnp.float32)
    weight, bias = init_mlp_layer_params(kp, dim_in, dim_out)

    # One-time param prep (weight transpose hoisted out of the forward path).
    w_t, b2 = prepare_mlp_layer_params(weight, bias)

    # f32 path (single-block fast path at this size).
    out = jax.block_until_ready(mlp_layer_forward(x, w_t, b2))
    ref = jnp.maximum(x @ weight.T + bias, 0.0)
    assert out.shape == (M, dim_out)
    assert jnp.allclose(out, ref, atol=1e-5, rtol=1e-5)

    # Multi-block + ragged-M path (padding handled in the wrapper).
    M2 = 1000  # not a multiple of 8 or of the tile size
    x2 = jax.random.normal(kx, (M2, dim_in), jnp.float32)
    out2 = jax.block_until_ready(mlp_layer_forward(x2, w_t, b2, tm=512))
    ref2 = jnp.maximum(x2 @ weight.T + bias, 0.0)
    assert out2.shape == (M2, dim_out)
    assert jnp.allclose(out2, ref2, atol=1e-5, rtol=1e-5)

    # bf16-input path (f32 accumulation + bias/ReLU), looser tolerance.
    out3 = jax.block_until_ready(
        mlp_layer_forward(x, w_t, b2, compute_dtype=jnp.bfloat16))
    assert out3.shape == (M, dim_out)
    assert jnp.allclose(out3, ref, atol=5e-2, rtol=5e-2)

    print("KERNEL_OK")
</pallas_src>

<mosaic_0001>
module attributes {stable_mosaic.version = 11 : i64} {
  func.func @_mlp_layer_kernel(%arg0: i32, %arg1: memref<256x64xf32, #tpu.memory_space<vmem>>, %arg2: memref<64x128xf32, #tpu.memory_space<vmem>>, %arg3: memref<1x128xf32, #tpu.memory_space<vmem>>, %arg4: memref<256x128xf32, #tpu.memory_space<vmem>>) attributes {dimension_semantics = [#tpu.dimension_semantics<parallel>], iteration_bounds = array<i64: 1>, scalar_prefetch = 0 : i64, scratch_operands = 0 : i64, tpu.core_type = #tpu.core_type<tc>, window_params = [{transform_indices = @transform_0, window_bounds = array<i64: 256, 64>}, {pipeline_mode = #tpu.pipeline_mode<synchronous>, transform_indices = @transform_1, window_bounds = array<i64: 64, 128>}, {pipeline_mode = #tpu.pipeline_mode<synchronous>, transform_indices = @transform_2, window_bounds = array<i64: 1, 128>}, {transform_indices = @transform_3, window_bounds = array<i64: 256, 128>}]} {
    %c0 = arith.constant 0 : index
    %c0_0 = arith.constant 0 : index
    %0 = vector.load %arg1[%c0, %c0_0] : memref<256x64xf32, #tpu.memory_space<vmem>>, vector<256x64xf32>
    %c0_1 = arith.constant 0 : index
    %c0_2 = arith.constant 0 : index
    %1 = vector.load %arg2[%c0_1, %c0_2] : memref<64x128xf32, #tpu.memory_space<vmem>>, vector<64x128xf32>
    %cst = arith.constant dense<0.000000e+00> : vector<256x128xf32>
    %2 = tpu.matmul %0, %1, %cst {dimension_numbers = #tpu.dot_dimension_numbers<[1], [0], [0], [1], [0, 0, 1, 1], [], []>} : vector<256x64xf32>, vector<64x128xf32>, vector<256x128xf32> -> vector<256x128xf32>
    %c0_3 = arith.constant 0 : index
    %c0_4 = arith.constant 0 : index
    %3 = vector.load %arg3[%c0_3, %c0_4] : memref<1x128xf32, #tpu.memory_space<vmem>>, vector<1x128xf32>
    %4 = vector.broadcast %3 : vector<1x128xf32> to vector<256x128xf32>
    %5 = arith.addf %2, %4 : vector<256x128xf32>
    %cst_5 = arith.constant 0.000000e+00 : f32
    %6 = vector.broadcast %cst_5 : f32 to vector<256x128xf32>
    %7 = arith.maximumf %5, %6 : vector<256x128xf32>
    %c0_6 = arith.constant 0 : index
    %c0_7 = arith.constant 0 : index
    %8 = vector.load %arg4[%c0_6, %c0_7] : memref<256x128xf32, #tpu.memory_space<vmem>>, vector<256x128xf32>
    tpu.vector_store %arg4[%c0_6, %c0_7], %7 {strides = array<i32>} : memref<256x128xf32, #tpu.memory_space<vmem>>, vector<256x128xf32>,
    return
  }
  func.func @transform_0(%arg0: i32) -> (i32, i32) {
    %c0_i32 = arith.constant 0 : i32
    %c0_i32_0 = arith.constant 0 : i32
    return %arg0, %c0_i32 : i32, i32
  }
  func.func @transform_1(%arg0: i32) -> (i32, i32) {
    %c0_i32 = arith.constant 0 : i32
    %c0_i32_0 = arith.constant 0 : i32
    %c0_i32_1 = arith.constant 0 : i32
    return %c0_i32, %c0_i32_0 : i32, i32
  }
  func.func @transform_2(%arg0: i32) -> (i32, i32) {
    %c0_i32 = arith.constant 0 : i32
    %c0_i32_0 = arith.constant 0 : i32
    %c0_i32_1 = arith.constant 0 : i32
    return %c0_i32, %c0_i32_0 : i32, i32
  }
  func.func @transform_3(%arg0: i32) -> (i32, i32) {
    %c0_i32 = arith.constant 0 : i32
    %c0_i32_0 = arith.constant 0 : i32
    return %arg0, %c0_i32 : i32, i32
  }
}

</mosaic_0001>

<bundles_post_ra>
// kernel: _mlp_layer_call.1
= control target key start
LH: loop header
LB: loop body
LE: loop exit
PB: predicated region body
PF: predicated region fallthrough
CT: control target
= control target key end

     0   :  { %s857_s0 = inlined_call_operand.vmem [shape: f32[256,64], index: 0, kind: input, shape index: {}]   ;;  %s858_s1 = inlined_call_operand.vmem [shape: f32[64,128], index: 1, kind: input, shape index: {}]   ;;  %s859_s2 = inlined_call_operand.vmem [shape: f32[1,128], index: 2, kind: input, shape index: {}]   ;;  %s860_s3 = inlined_call_operand.hbm [shape: f32[256,128], index: 3, kind: output, shape index: {}]  }
   0x1   :  { %v54_v0 = vld [vmem:[%s858_s1 + $0x38] sm:$0xff]  ;;  %v53_v1 = vld [vmem:[%s858_s1 + $0x30] sm:$0xff]  ;;  %v52_v2 = vld [vmem:[%s858_s1 + $0x28] sm:$0xff] }
   0x2   :  { %537 = vmatprep.subr.mxu0 %v54_v0  ;;  %601 = vmatprep.subr.mxu1 %v54_v0  ;;  %v51_v3 = vld [vmem:[%s858_s1 + $0x20] sm:$0xff]  ;;  %v50_v4 = vld [vmem:[%s858_s1 + $0x18] sm:$0xff]  ;;  %v49_v5 = vld [vmem:[%s858_s1 + $0x10] sm:$0xff] }
   0x3   :  { %538 = vmatpush3.msra.mxu0 %v54_v0  ;;  %609 = vmatpush3.msra.mxu1 %v54_v0  ;;  %v48_v6 = vld [vmem:[%s858_s1 + $0x8] sm:$0xff]  ;;  %v47_v7 = vld [vmem:[%s858_s1] sm:$0xff] }
   0x4   :  { %539 = vmatprep.subr.mxu0 %v53_v1  ;;  %602 = vmatprep.subr.mxu1 %v53_v1 }
   0x5   :  { %540 = vmatpush3.msra.mxu0 %v53_v1  ;;  %610 = vmatpush3.msra.mxu1 %v53_v1 }
   0x6   :  { %541 = vmatprep.subr.mxu0 %v52_v2  ;;  %603 = vmatprep.subr.mxu1 %v52_v2 }
   0x7   :  { %542 = vmatpush3.msra.mxu0 %v52_v2  ;;  %611 = vmatpush3.msra.mxu1 %v52_v2 }
   0x8   :  { %543 = vmatprep.subr.mxu0 %v51_v3  ;;  %604 = vmatprep.subr.mxu1 %v51_v3 }
   0x9   :  { %544 = vmatpush3.msra.mxu0 %v51_v3  ;;  %612 = vmatpush3.msra.mxu1 %v51_v3 }
   0xa   :  { %545 = vmatprep.subr.mxu0 %v50_v4  ;;  %605 = vmatprep.subr.mxu1 %v50_v4 }
   0xb   :  { %546 = vmatpush3.msra.mxu0 %v50_v4  ;;  %613 = vmatpush3.msra.mxu1 %v50_v4 }
   0xc   :  { %547 = vmatprep.subr.mxu0 %v49_v5  ;;  %606 = vmatprep.subr.mxu1 %v49_v5 }
   0xd   :  { %548 = vmatpush3.msra.mxu0 %v49_v5  ;;  %614 = vmatpush3.msra.mxu1 %v49_v5 }
   0xe   :  { %549 = vmatprep.subr.mxu0 %v48_v6  ;;  %607 = vmatprep.subr.mxu1 %v48_v6 }
   0xf   :  { %8 = vsyncpa [#allocation3], 0  ;;  %550 = vmatpush3.msra.mxu0 %v48_v6  ;;  %615 = vmatpush3.msra.mxu1 %v48_v6  ;;  %v15_v8 = vld [vmem:[%s857_s0] sm:$0xff]  ;;  %vm62_vm0 = vcmask 523264   ;;  %v16_v10 = vld [vmem:[%s857_s0 + $0x8] sm:$0xff] }
  0x10   :  { %v31_v9 = vld [vmem:[%s857_s0 + $0x80] sm:$0xff]  ;;  %551 = vmatprep.subr.mxu0 %v47_v7  ;;  %608 = vmatprep.subr.mxu1 %v47_v7  ;;  %v32_v11 = vld [vmem:[%s857_s0 + $0x88] sm:$0xff]  ;;  %v17_v12 = vld [vmem:[%s857_s0 + $0x10] sm:$0xff] }
  0x11   :  { %552 = vmatpush3.msra.mxu0 %v47_v7  ;;  %616 = vmatpush3.msra.mxu1 %v47_v7  ;;  %v33_v13 = vld [vmem:[%s857_s0 + $0x90] sm:$0xff]  ;;  %v18_v14 = vld [vmem:[%s857_s0 + $0x18] sm:$0xff]  ;;  %v19_v16 = vld [vmem:[%s857_s0 + $0x20] sm:$0xff] }
  0x12   :  { %553 = vmatprep.mubr.msk.f32.mxu0 %vm62_vm0, %v15_v8  ;;  %577 = vmatprep.mubr.msk.f32.mxu1 %vm62_vm0, %v31_v9  ;;  %v34_v15 = vld [vmem:[%s857_s0 + $0x98] sm:$0xff]  ;;  %v35_v17 = vld [vmem:[%s857_s0 + $0xa0] sm:$0xff]  ;;  %v20_v18 = vld [vmem:[%s857_s0 + $0x28] sm:$0xff] }
  0x13   :  { %554 = vmatmul.mubr.msk.f32.vlgmr.msra.gmra.mxu0 %vm62_vm0, %v16_v10  ;;  %578 = vmatmul.mubr.msk.f32.vlgmr.msra.gmra.mxu1 %vm62_vm0, %v32_v11  ;;  %v36_v19 = vld [vmem:[%s857_s0 + $0xa8] sm:$0xff]  ;;  %v21_v20 = vld [vmem:[%s857_s0 + $0x30] sm:$0xff]  ;;  %v22_v22 = vld [vmem:[%s857_s0 + $0x38] sm:$0xff] }
  0x14   :  { %556 = vmatprep.mubr.msk.f32.mxu0 %vm62_vm0, %v17_v12  ;;  %580 = vmatprep.mubr.msk.f32.mxu1 %vm62_vm0, %v33_v13  ;;  %v37_v21 = vld [vmem:[%s857_s0 + $0xb0] sm:$0xff]  ;;  %v38_v23 = vld [vmem:[%s857_s0 + $0xb8] sm:$0xff]  ;;  %v23_v24 = vld [vmem:[%s857_s0 + $0x40] sm:$0xff] }
  0x15   :  { %v39_v25 = vld [vmem:[%s857_s0 + $0xc0] sm:$0xff]  ;;  %v24_v26 = vld [vmem:[%s857_s0 + $0x48] sm:$0xff]  ;;  %v25_v28 = vld [vmem:[%s857_s0 + $0x50] sm:$0xff] }
  0x16   :  { %v40_v27 = vld [vmem:[%s857_s0 + $0xc8] sm:$0xff]  ;;  %v41_v29 = vld [vmem:[%s857_s0 + $0xd0] sm:$0xff]  ;;  %v26_v30 = vld [vmem:[%s857_s0 + $0x58] sm:$0xff] }
  0x17   :  { %557 = vmatmul.mubr.msk.f32.gmra.mxu0 %vm62_vm0, %v18_v14  ;;  %581 = vmatmul.mubr.msk.f32.gmra.mxu1 %vm62_vm0, %v34_v15  ;;  %v42_v31 = vld [vmem:[%s857_s0 + $0xd8] sm:$0xff]  ;;  %v27_v32 = vld [vmem:[%s857_s0 + $0x60] sm:$0xff]  ;;  %v28_v34 = vld [vmem:[%s857_s0 + $0x68] sm:$0xff] }
  0x18   :  { %559 = vmatprep.mubr.msk.f32.mxu0 %vm62_vm0, %v19_v16  ;;  %583 = vmatprep.mubr.msk.f32.mxu1 %vm62_vm0, %v35_v17  ;;  %v43_v33 = vld [vmem:[%s857_s0 + $0xe0] sm:$0xff]  ;;  %v44_v35 = vld [vmem:[%s857_s0 + $0xe8] sm:$0xff]  ;;  %v29_v36 = vld [vmem:[%s857_s0 + $0x70] sm:$0xff] }
  0x19   :  { %v45_v37 = vld [vmem:[%s857_s0 + $0xf0] sm:$0xff]  ;;  %v30_v38 = vld [vmem:[%s857_s0 + $0x78] sm:$0xff]  ;;  %v820_v40 = vld [vmem:[%s859_s2] ss:$0 sm:$0xff] }
  0x1a   :  { %v46_v39 = vld [vmem:[%s857_s0 + $0xf8] sm:$0xff]  ;;  %s642_s0 = smov [#allocation2]  }
  0x1b   :  { %560 = vmatmul.mubr.msk.f32.gmra.mxu0 %vm62_vm0, %v20_v18  ;;  %584 = vmatmul.mubr.msk.f32.gmra.mxu1 %vm62_vm0, %v36_v19  ;;  %s453_s2 = sshll.u32 %s642_s0, 4  ;;  %s454_s2 = int_to_ptr.vmem [resolvable:$true] %s453_s2 }
  0x1c   :  { %562 = vmatprep.mubr.msk.f32.mxu0 %vm62_vm0, %v21_v20  ;;  %586 = vmatprep.mubr.msk.f32.mxu1 %vm62_vm0, %v37_v21  ;;  %s620_s10 = scalar_lea.vmem %s454_s2, 4096  ;;  %p625_p1 = scmp.lt.s32.totalorder %s454_s2, %s454_s2 }
  0x1d   :  { %p621_p0 = scmp.ne.s32.totalorder %s454_s2, %s620_s10  ;;  %p626_p2 = scmp.lt.s32.totalorder %s620_s10, %s620_s10 }
  0x1f   :  { %563 = vmatmul.mubr.msk.f32.gmra.mxu0 %vm62_vm0, %v22_v22  ;;  %587 = vmatmul.mubr.msk.f32.gmra.mxu1 %vm62_vm0, %v38_v23  ;;  %p627_p3 = por %p626_p2, %p625_p1 }
  0x20   :  { %565 = vmatprep.mubr.msk.f32.mxu0 %vm62_vm0, %v23_v24  ;;  %589 = vmatprep.mubr.msk.f32.mxu1 %vm62_vm0, %v39_v25 }
  0x21   :  { %p628_p4 = pnand %p627_p3, %p621_p0 }
  0x23   :  { %566 = vmatmul.mubr.msk.f32.gmra.mxu0 %vm62_vm0, %v24_v26  ;;  %590 = vmatmul.mubr.msk.f32.gmra.mxu1 %vm62_vm0, %v40_v27 }
  0x24   :  { %568 = vmatprep.mubr.msk.f32.mxu0 %vm62_vm0, %v25_v28  ;;  %592 = vmatprep.mubr.msk.f32.mxu1 %vm62_vm0, %v41_v29 }
  0x27   :  { %569 = vmatmul.mubr.msk.f32.gmra.mxu0 %vm62_vm0, %v26_v30  ;;  %593 = vmatmul.mubr.msk.f32.gmra.mxu1 %vm62_vm0, %v42_v31 }
  0x28   :  { %571 = vmatprep.mubr.msk.f32.mxu0 %vm62_vm0, %v27_v32  ;;  %595 = vmatprep.mubr.msk.f32.mxu1 %vm62_vm0, %v43_v33 }
  0x2b   :  { %572 = vmatmul.mubr.msk.f32.gmra.mxu0 %vm62_vm0, %v28_v34  ;;  %596 = vmatmul.mubr.msk.f32.gmra.mxu1 %vm62_vm0, %v44_v35 }
  0x2c   :  { %574 = vmatprep.mubr.msk.f32.mxu0 %vm62_vm0, %v29_v36  ;;  %598 = vmatprep.mubr.msk.f32.mxu1 %vm62_vm0, %v45_v37 }
  0x2f   :  { %575 = vmatmul.mubr.msk.f32.gmra.mxu0 %vm62_vm0, %v30_v38  ;;  %599 = vmatmul.mubr.msk.f32.gmra.mxu1 %vm62_vm0, %v46_v39 }
  0xd3   :  { %v555_v41 = vpop.f32.mrf.mxu0  ;;  %v579_v42 = vpop.f32.mrf.mxu1 }
  0xd4   :  { %v231_v43 = vadd.f32 %v555_v41, %v820_v40  ;;  %v311_v44 = vadd.f32 %v579_v42, %v820_v40 }
  0xd5   :  { %v225_v45 = vpop.f32.mrf.mxu0  ;;  %v305_v46 = vpop.f32.mrf.mxu1 }
  0xd6   :  { %v385_v47 = vmax.f32 %v231_v43, 0.0  ;;  %v401_v48 = vmax.f32 %v311_v44, 0.0  ;;  %v226_v49 = vadd.f32 %v820_v40, %v225_v45  ;;  %v306_v50 = vadd.f32 %v820_v40, %v305_v46 }
  0xd7   :  { %v558_v51 = vpop.f32.mrf.mxu0  ;;  %v582_v52 = vpop.f32.mrf.mxu1 }
  0xd8   :  { %417 = vst [vmem:[#allocation2 + $0x8] sm:$0xff] %v385_v47  ;;  %433 = vst [vmem:[#allocation2 + $0x88] sm:$0xff] %v401_v48  ;;  %v384_v53 = vmax.f32 %v226_v49, 0.0  ;;  %v400_v54 = vmax.f32 %v306_v50, 0.0  ;;  %v241_v55 = vadd.f32 %v558_v51, %v820_v40  ;;  %v321_v56 = vadd.f32 %v582_v52, %v820_v40 }
  0xd9   :  { %v235_v57 = vpop.f32.mrf.mxu0  ;;  %v315_v58 = vpop.f32.mrf.mxu1 }
  0xda   :  { %416 = vst [vmem:[#allocation2] sm:$0xff] %v384_v53  ;;  %432 = vst [vmem:[#allocation2 + $0x80] sm:$0xff] %v400_v54  ;;  %v387_v59 = vmax.f32 %v241_v55, 0.0  ;;  %v403_v60 = vmax.f32 %v321_v56, 0.0  ;;  %v236_v61 = vadd.f32 %v820_v40, %v235_v57  ;;  %v316_v62 = vadd.f32 %v820_v40, %v315_v58 }
  0xdb   :  { %v561_v63 = vpop.f32.mrf.mxu0  ;;  %v585_v0 = vpop.f32.mrf.mxu1 }
  0xdc   :  { %419 = vst [vmem:[#allocation2 + $0x18] sm:$0xff] %v387_v59  ;;  %435 = vst [vmem:[#allocation2 + $0x98] sm:$0xff] %v403_v60  ;;  %v386_v1 = vmax.f32 %v236_v61, 0.0  ;;  %v402_v2 = vmax.f32 %v316_v62, 0.0  ;;  %v251_v3 = vadd.f32 %v561_v63, %v820_v40  ;;  %v331_v4 = vadd.f32 %v585_v0, %v820_v40 }
  0xdd   :  { %v245_v5 = vpop.f32.mrf.mxu0  ;;  %v325_v6 = vpop.f32.mrf.mxu1 }
  0xde   :  { %418 = vst [vmem:[#allocation2 + $0x10] sm:$0xff] %v386_v1  ;;  %434 = vst [vmem:[#allocation2 + $0x90] sm:$0xff] %v402_v2  ;;  %v389_v7 = vmax.f32 %v251_v3, 0.0  ;;  %v405_v8 = vmax.f32 %v331_v4, 0.0  ;;  %v246_v9 = vadd.f32 %v820_v40, %v245_v5  ;;  %v326_v10 = vadd.f32 %v820_v40, %v325_v6 }
  0xdf   :  { %v564_v11 = vpop.f32.mrf.mxu0  ;;  %v588_v12 = vpop.f32.mrf.mxu1 }
  0xe0   :  { %421 = vst [vmem:[#allocation2 + $0x28] sm:$0xff] %v389_v7  ;;  %437 = vst [vmem:[#allocation2 + $0xa8] sm:$0xff] %v405_v8  ;;  %v388_v13 = vmax.f32 %v246_v9, 0.0  ;;  %v404_v14 = vmax.f32 %v326_v10, 0.0  ;;  %v261_v15 = vadd.f32 %v564_v11, %v820_v40  ;;  %v341_v16 = vadd.f32 %v588_v12, %v820_v40 }
  0xe1   :  { %v255_v17 = vpop.f32.mrf.mxu0  ;;  %v335_v18 = vpop.f32.mrf.mxu1 }
  0xe2   :  { %420 = vst [vmem:[#allocation2 + $0x20] sm:$0xff] %v388_v13  ;;  %436 = vst [vmem:[#allocation2 + $0xa0] sm:$0xff] %v404_v14  ;;  %v391_v19 = vmax.f32 %v261_v15, 0.0  ;;  %v407_v20 = vmax.f32 %v341_v16, 0.0  ;;  %v256_v21 = vadd.f32 %v820_v40, %v255_v17  ;;  %v336_v22 = vadd.f32 %v820_v40, %v335_v18 }
  0xe3   :  { %v567_v23 = vpop.f32.mrf.mxu0  ;;  %v591_v24 = vpop.f32.mrf.mxu1 }
  0xe4   :  { %423 = vst [vmem:[#allocation2 + $0x38] sm:$0xff] %v391_v19  ;;  %439 = vst [vmem:[#allocation2 + $0xb8] sm:$0xff] %v407_v20  ;;  %v390_v25 = vmax.f32 %v256_v21, 0.0  ;;  %v406_v26 = vmax.f32 %v336_v22, 0.0  ;;  %v271_v27 = vadd.f32 %v567_v23, %v820_v40  ;;  %v351_v28 = vadd.f32 %v591_v24, %v820_v40 }
  0xe5   :  { %v265_v29 = vpop.f32.mrf.mxu0  ;;  %v345_v30 = vpop.f32.mrf.mxu1 }
  0xe6   :  { %422 = vst [vmem:[#allocation2 + $0x30] sm:$0xff] %v390_v25  ;;  %438 = vst [vmem:[#allocation2 + $0xb0] sm:$0xff] %v406_v26  ;;  %v393_v31 = vmax.f32 %v271_v27, 0.0  ;;  %v409_v32 = vmax.f32 %v351_v28, 0.0  ;;  %v266_v33 = vadd.f32 %v820_v40, %v265_v29  ;;  %v346_v34 = vadd.f32 %v820_v40, %v345_v30 }
  0xe7   :  { %v570_v35 = vpop.f32.mrf.mxu0  ;;  %v594_v36 = vpop.f32.mrf.mxu1 }
  0xe8   :  { %425 = vst [vmem:[#allocation2 + $0x48] sm:$0xff] %v393_v31  ;;  %441 = vst [vmem:[#allocation2 + $0xc8] sm:$0xff] %v409_v32  ;;  %v392_v37 = vmax.f32 %v266_v33, 0.0  ;;  %v408_v38 = vmax.f32 %v346_v34, 0.0  ;;  %v281_v39 = vadd.f32 %v570_v35, %v820_v40  ;;  %v361_v41 = vadd.f32 %v594_v36, %v820_v40 }
  0xe9   :  { %v275_v42 = vpop.f32.mrf.mxu0  ;;  %v355_v43 = vpop.f32.mrf.mxu1 }
  0xea   :  { %424 = vst [vmem:[#allocation2 + $0x40] sm:$0xff] %v392_v37  ;;  %440 = vst [vmem:[#allocation2 + $0xc0] sm:$0xff] %v408_v38  ;;  %v395_v44 = vmax.f32 %v281_v39, 0.0  ;;  %v411_v45 = vmax.f32 %v361_v41, 0.0  ;;  %v276_v46 = vadd.f32 %v820_v40, %v275_v42  ;;  %v356_v47 = vadd.f32 %v820_v40, %v355_v43 }
  0xeb   :  { %v573_v48 = vpop.f32.mrf.mxu0  ;;  %v597_v49 = vpop.f32.mrf.mxu1 }
  0xec   :  { %427 = vst [vmem:[#allocation2 + $0x58] sm:$0xff] %v395_v44  ;;  %443 = vst [vmem:[#allocation2 + $0xd8] sm:$0xff] %v411_v45  ;;  %v394_v50 = vmax.f32 %v276_v46, 0.0  ;;  %v410_v51 = vmax.f32 %v356_v47, 0.0  ;;  %v291_v52 = vadd.f32 %v573_v48, %v820_v40  ;;  %v371_v53 = vadd.f32 %v597_v49, %v820_v40 }
  0xed   :  { %v285_v54 = vpop.f32.mrf.mxu0  ;;  %v365_v55 = vpop.f32.mrf.mxu1 }
  0xee   :  { %426 = vst [vmem:[#allocation2 + $0x50] sm:$0xff] %v394_v50  ;;  %442 = vst [vmem:[#allocation2 + $0xd0] sm:$0xff] %v410_v51  ;;  %v397_v56 = vmax.f32 %v291_v52, 0.0  ;;  %v413_v57 = vmax.f32 %v371_v53, 0.0  ;;  %v286_v58 = vadd.f32 %v820_v40, %v285_v54  ;;  %v366_v59 = vadd.f32 %v820_v40, %v365_v55 }
  0xef   :  { %v576_v60 = vpop.f32.mrf.mxu0  ;;  %v600_v61 = vpop.f32.mrf.mxu1 }
  0xf0   :  { %429 = vst [vmem:[#allocation2 + $0x68] sm:$0xff] %v397_v56  ;;  %445 = vst [vmem:[#allocation2 + $0xe8] sm:$0xff] %v413_v57  ;;  %v396_v62 = vmax.f32 %v286_v58, 0.0  ;;  %v412_v63 = vmax.f32 %v366_v59, 0.0  ;;  %v301_v0 = vadd.f32 %v576_v60, %v820_v40  ;;  %v381_v1 = vadd.f32 %v600_v61, %v820_v40 }
  0xf1   :  { %v295_v2 = vpop.f32.mrf.mxu0  ;;  %v375_v3 = vpop.f32.mrf.mxu1 }
  0xf2   :  { %428 = vst [vmem:[#allocation2 + $0x60] sm:$0xff] %v396_v62  ;;  %444 = vst [vmem:[#allocation2 + $0xe0] sm:$0xff] %v412_v63  ;;  %v399_v4 = vmax.f32 %v301_v0, 0.0  ;;  %v415_v5 = vmax.f32 %v381_v1, 0.0  ;;  %v296_v6 = vadd.f32 %v820_v40, %v295_v2  ;;  %v376_v7 = vadd.f32 %v820_v40, %v375_v3 }
  0xf4   :  { %431 = vst [vmem:[#allocation2 + $0x78] sm:$0xff] %v399_v4  ;;  %447 = vst [vmem:[#allocation2 + $0xf8] sm:$0xff] %v415_v5  ;;  %v398_v8 = vmax.f32 %v296_v6, 0.0  ;;  %v414_v9 = vmax.f32 %v376_v7, 0.0 }
  0xf6   :  { %430 = vst [vmem:[#allocation2 + $0x70] sm:$0xff] %v398_v8  ;;  %446 = vst [vmem:[#allocation2 + $0xf0] sm:$0xff] %v414_v9 }
  0xf7   :  { %631 = shalt.err (!%p628_p4)
}
  0xf8   :  { %s643_s11 = smov 128   ;;  %s644_s12 = smov 8  }
  0xf9   :  { %459 = dma.vmem_to_hbm [thread:$0]  %s454_s2, 4096, %s860_s3, [#allocation3], %s643_s11, %s643_s11, %s644_s12  }
  0xfa   :  { %640 = dma.done.wait [#allocation3], 4096  }
  0xfb   :  { %641 = vsyncadd [#allocation3], 4294963200 }
  0xfc   :  { %463 = vsyncpa [#allocation3], 1 }

</bundles_post_ra>
